<compile_context>
chip_gen: v7x
topology: tpu7x:2x2x1
jax: 0.10.0
libtpu: 0.0.40
codegen_flags: <defaults>
</compile_context>

<pallas_src>
import functools

import jax
import jax.numpy as jnp
from jax import lax
from jax.experimental import pallas as pl
from jax.experimental.pallas import tpu as pltpu

EPS = 1e-5    # nn.BatchNorm2d default eps
TM = 256      # max row tile (multiple of 8 sublanes)


# ----------------------------- Pallas kernels ------------------------------ #

def _mm_affine_relu_kernel(p_ref, w_ref, scale_ref, shift_ref, o_ref):
    # out = relu((P @ W) * scale + shift)   -- conv + folded BN + ReLU
    acc = jnp.dot(p_ref[...], w_ref[...], preferred_element_type=jnp.float32)
    o_ref[...] = jnp.maximum(acc * scale_ref[...] + shift_ref[...],
                             0.0).astype(o_ref.dtype)


def _mm_residual_kernel(p_ref, w_ref, res_ref, o_ref):
    # out = (P @ W) + residual   -- conv + residual add
    acc = jnp.dot(p_ref[...], w_ref[...], preferred_element_type=jnp.float32)
    o_ref[...] = (acc + res_ref[...]).astype(o_ref.dtype)


def _mm_plain_kernel(p_ref, w_ref, o_ref):
    # out = P @ W   -- plain conv (1x1 shortcut)
    o_ref[...] = jnp.dot(p_ref[...], w_ref[...],
                         preferred_element_type=jnp.float32).astype(o_ref.dtype)


# ------------------------------ Pallas wrappers ---------------------------- #

def _row_tile(m):
    # Biggest row tile <= TM rounded up to the 8-sublane granule; boundary
    # blocks of a pl.cdiv grid are masked by Pallas, so no jnp.pad is needed.
    return min(TM, ((m + 7) // 8) * 8)


def _mosaic_params():
    return pltpu.CompilerParams(dimension_semantics=("parallel",))


def conv_bn_relu(patches, w_mat, scale, shift, out_dtype=jnp.bfloat16):
    """Pallas matmul with fused BN-affine + ReLU epilogue (no residual read)."""
    m, k = patches.shape
    cout = w_mat.shape[1]
    tm = _row_tile(m)
    return pl.pallas_call(
        _mm_affine_relu_kernel,
        out_shape=jax.ShapeDtypeStruct((m, cout), out_dtype),
        grid=(pl.cdiv(m, tm),),
        in_specs=[pl.BlockSpec((tm, k), lambda i: (i, 0)),
                  pl.BlockSpec((k, cout), lambda i: (0, 0)),
                  pl.BlockSpec((1, cout), lambda i: (0, 0)),
                  pl.BlockSpec((1, cout), lambda i: (0, 0))],
        out_specs=pl.BlockSpec((tm, cout), lambda i: (i, 0)),
        compiler_params=_mosaic_params(),
    )(patches, w_mat, scale.reshape(1, cout), shift.reshape(1, cout))


def conv_add(patches, w_mat, residual):
    """Pallas matmul with fused residual-add epilogue."""
    m, k = patches.shape
    cout = w_mat.shape[1]
    tm = _row_tile(m)
    return pl.pallas_call(
        _mm_residual_kernel,
        out_shape=jax.ShapeDtypeStruct((m, cout), jnp.float32),
        grid=(pl.cdiv(m, tm),),
        in_specs=[pl.BlockSpec((tm, k), lambda i: (i, 0)),
                  pl.BlockSpec((k, cout), lambda i: (0, 0)),
                  pl.BlockSpec((tm, cout), lambda i: (i, 0))],
        out_specs=pl.BlockSpec((tm, cout), lambda i: (i, 0)),
        compiler_params=_mosaic_params(),
    )(patches, w_mat, residual)


def conv_plain(patches, w_mat):
    """Pallas matmul, no epilogue (1x1 convShortcut)."""
    m, k = patches.shape
    cout = w_mat.shape[1]
    tm = _row_tile(m)
    return pl.pallas_call(
        _mm_plain_kernel,
        out_shape=jax.ShapeDtypeStruct((m, cout), jnp.float32),
        grid=(pl.cdiv(m, tm),),
        in_specs=[pl.BlockSpec((tm, k), lambda i: (i, 0)),
                  pl.BlockSpec((k, cout), lambda i: (0, 0))],
        out_specs=pl.BlockSpec((tm, cout), lambda i: (i, 0)),
        compiler_params=_mosaic_params(),
    )(patches, w_mat)


# ------------------------------- JAX glue ----------------------------------- #

def im2col3x3(x_nhwc, stride, out_dtype=jnp.bfloat16):
    """3x3, pad=1 patch extraction. Returns ((N*Ho*Wo, 9*C) bf16, (Ho, Wo))."""
    n, h, w, c = x_nhwc.shape
    ho = (h - 1) // stride + 1
    wo = (w - 1) // stride + 1
    xp = jnp.pad(x_nhwc, ((0, 0), (1, 1), (1, 1), (0, 0)))
    cols = [xp[:, dy:dy + (ho - 1) * stride + 1:stride,
               dx:dx + (wo - 1) * stride + 1:stride, :]
            for dy in range(3) for dx in range(3)]
    patches = jnp.concatenate(cols, axis=-1).astype(out_dtype)   # tap-major
    return patches.reshape(n * ho * wo, 9 * c), (ho, wo)


def _to_mat(w_oihw, dtype=jnp.bfloat16):
    # torch OIHW -> im2col matrix (kh*kw*I, O), matching tap-major patch order
    return jnp.transpose(w_oihw, (2, 3, 1, 0)).reshape(
        -1, w_oihw.shape[0]).astype(dtype)


def _fold_bn(gamma, beta, mean, var):
    scale = gamma / jnp.sqrt(var + EPS)
    shift = beta - mean * scale
    return scale, shift


def basic_block_forward(x, params, stride):
    """BasicBlock.forward on an NHWC f32 activation (Pallas conv kernels)."""
    equal_in_out = params["w_sc_oihw"] is None
    n, h, w, cin = x.shape
    cout = params["w1_oihw"].shape[0]

    s1, b1 = _fold_bn(params["bn1_gamma"], params["bn1_beta"],
                      params["bn1_mean"], params["bn1_var"])
    s2, b2 = _fold_bn(params["bn2_gamma"], params["bn2_beta"],
                      params["bn2_mean"], params["bn2_var"])

    # relu(bn1(x)) fused into the patch producer (never round-tripped alone).
    a = jnp.maximum(x * s1 + b1, 0.0)

    # conv1 + bn2 + relu  (Pallas MXU kernel, fused affine/ReLU epilogue)
    p1, (ho, wo) = im2col3x3(a, stride)
    b = conv_bn_relu(p1, _to_mat(params["w1_oihw"]), s2,
                     b2).reshape(n, ho, wo, cout)

    # conv2 + residual  (Pallas MXU kernel, fused add epilogue)
    p2, _ = im2col3x3(b, 1)
    if equal_in_out:
        residual = x.reshape(n * h * w, cin)          # torch adds raw input x
    else:
        # convShortcut: 1x1 stride-s conv on relu(bn1(x)); computed first and
        # fed to the conv2 matmul as its residual (no zero-residual reads).
        a_s = jnp.maximum(x[:, ::stride, ::stride, :] * s1 + b1, 0.0)
        residual = conv_plain(
            a_s.astype(jnp.bfloat16).reshape(n * ho * wo, cin),
            _to_mat(params["w_sc_oihw"]))
    out = conv_add(p2, _to_mat(params["w2_oihw"]), residual)
    return out.reshape(n, ho, wo, cout)


def network_block_forward(x_nchw, block_params, stride):
    """NetworkBlock.forward: sequential BasicBlocks.  NCHW in / NCHW out."""
    x = jnp.transpose(x_nchw, (0, 2, 3, 1)).astype(jnp.float32)   # NHWC
    for i, p in enumerate(block_params):
        x = basic_block_forward(x, p, stride if i == 0 else 1)
    return jnp.transpose(x, (0, 3, 1, 2))


# ------------------------------- parameters --------------------------------- #

def init_basic_block(key, in_planes, out_planes):
    ks = jax.random.split(key, 11)
    nrm = lambda k, shape, s: s * jax.random.normal(k, shape, jnp.float32)
    equal = in_planes == out_planes
    return dict(
        bn1_gamma=1.0 + 0.1 * jax.random.normal(ks[0], (in_planes,), jnp.float32),
        bn1_beta=nrm(ks[1], (in_planes,), 0.1),
        bn1_mean=nrm(ks[2], (in_planes,), 0.1),
        bn1_var=0.8 + 0.4 * jax.random.uniform(ks[3], (in_planes,), jnp.float32),
        bn2_gamma=1.0 + 0.1 * jax.random.normal(ks[4], (out_planes,), jnp.float32),
        bn2_beta=nrm(ks[5], (out_planes,), 0.1),
        bn2_mean=nrm(ks[6], (out_planes,), 0.1),
        bn2_var=0.8 + 0.4 * jax.random.uniform(ks[7], (out_planes,), jnp.float32),
        w1_oihw=nrm(ks[8], (out_planes, in_planes, 3, 3), 0.2),
        w2_oihw=nrm(ks[9], (out_planes, out_planes, 3, 3), 0.2),
        w_sc_oihw=None if equal else nrm(ks[10], (out_planes, in_planes, 1, 1), 0.2),
    )


def init_network_block(key, nb_layers, in_planes, out_planes):
    keys = jax.random.split(key, nb_layers)
    return [init_basic_block(keys[i], in_planes if i == 0 else out_planes,
                             out_planes)
            for i in range(nb_layers)]


# ----------------------------- pure-JAX reference --------------------------- #

def _reference_basic_block(x_nchw, params, stride):
    def bn(x, g, b, m, v):
        s = g / jnp.sqrt(v + EPS)
        return x * s[None, :, None, None] + (b - m * s)[None, :, None, None]

    def conv(x, w, s, p):
        return lax.conv_general_dilated(
            x, w, (s, s), [(p, p), (p, p)],
            dimension_numbers=("NCHW", "OIHW", "NCHW"),
            precision=lax.Precision.HIGHEST)

    equal = params["w_sc_oihw"] is None
    a = jax.nn.relu(bn(x_nchw, params["bn1_gamma"], params["bn1_beta"],
                       params["bn1_mean"], params["bn1_var"]))
    out = jax.nn.relu(bn(conv(a, params["w1_oihw"], stride, 1),
                         params["bn2_gamma"], params["bn2_beta"],
                         params["bn2_mean"], params["bn2_var"]))
    out = conv(out, params["w2_oihw"], 1, 1)
    shortcut = x_nchw if equal else conv(a, params["w_sc_oihw"], stride, 0)
    return shortcut + out


def reference_forward(x_nchw, block_params, stride):
    x = x_nchw
    for i, p in enumerate(block_params):
        x = _reference_basic_block(x, p, stride if i == 0 else 1)
    return x


# ----------------------------------- main ----------------------------------- #

if __name__ == "__main__":
    key = jax.random.PRNGKey(0)
    kx, kp = jax.random.split(key)

    # NetworkBlock(nb_layers=2, in_planes=4, out_planes=8, BasicBlock, stride=2):
    # layer 0 exercises the convShortcut / downsampling path, layer 1 the
    # equalInOut (raw-x residual) path.
    nb_layers, in_planes, out_planes, stride = 2, 4, 8, 2
    x = jax.random.normal(kx, (2, in_planes, 16, 16), jnp.float32)
    params = init_network_block(kp, nb_layers, in_planes, out_planes)

    fwd = jax.jit(functools.partial(network_block_forward, stride=stride))
    out = jax.block_until_ready(fwd(x, params))
    ref = reference_forward(x, params, stride)

    assert out.shape == (2, out_planes, 8, 8), out.shape
    # bf16 MXU operands (f32 accumulate) vs f32 reference -> slightly looser tol
    assert jnp.allclose(out, ref, atol=3e-2, rtol=3e-2), float(
        jnp.max(jnp.abs(out - ref)))
    print("KERNEL_OK")
</pallas_src>

<mosaic_0001>
module attributes {stable_mosaic.version = 11 : i64} {
  func.func @_mm_affine_relu_kernel(%arg0: i32, %arg1: memref<128x36xbf16, #tpu.memory_space<vmem>>, %arg2: memref<36x8xbf16, #tpu.memory_space<vmem>>, %arg3: memref<1x8xf32, #tpu.memory_space<vmem>>, %arg4: memref<1x8xf32, #tpu.memory_space<vmem>>, %arg5: memref<128x8xbf16, #tpu.memory_space<vmem>>) attributes {dimension_semantics = [#tpu.dimension_semantics<parallel>], iteration_bounds = array<i64: 1>, scalar_prefetch = 0 : i64, scratch_operands = 0 : i64, tpu.core_type = #tpu.core_type<tc>, window_params = [{transform_indices = @transform_0, window_bounds = array<i64: 128, 36>}, {pipeline_mode = #tpu.pipeline_mode<synchronous>, transform_indices = @transform_1, window_bounds = array<i64: 36, 8>}, {pipeline_mode = #tpu.pipeline_mode<synchronous>, transform_indices = @transform_2, window_bounds = array<i64: 1, 8>}, {pipeline_mode = #tpu.pipeline_mode<synchronous>, transform_indices = @transform_3, window_bounds = array<i64: 1, 8>}, {transform_indices = @transform_4, window_bounds = array<i64: 128, 8>}]} {
    %c0 = arith.constant 0 : index
    %c0_0 = arith.constant 0 : index
    %0 = vector.load %arg1[%c0, %c0_0] : memref<128x36xbf16, #tpu.memory_space<vmem>>, vector<128x36xbf16>
    %c0_1 = arith.constant 0 : index
    %c0_2 = arith.constant 0 : index
    %1 = vector.load %arg2[%c0_1, %c0_2] : memref<36x8xbf16, #tpu.memory_space<vmem>>, vector<36x8xbf16>
    %cst = arith.constant dense<0.000000e+00> : vector<128x8xf32>
    %2 = tpu.matmul %0, %1, %cst {dimension_numbers = #tpu.dot_dimension_numbers<[1], [0], [0], [1], [0, 0, 1, 1], [], []>} : vector<128x36xbf16>, vector<36x8xbf16>, vector<128x8xf32> -> vector<128x8xf32>
    %c0_3 = arith.constant 0 : index
    %c0_4 = arith.constant 0 : index
    %3 = vector.load %arg3[%c0_3, %c0_4] : memref<1x8xf32, #tpu.memory_space<vmem>>, vector<1x8xf32>
    %4 = vector.broadcast %3 : vector<1x8xf32> to vector<128x8xf32>
    %5 = arith.mulf %2, %4 : vector<128x8xf32>
    %c0_5 = arith.constant 0 : index
    %c0_6 = arith.constant 0 : index
    %6 = vector.load %arg4[%c0_5, %c0_6] : memref<1x8xf32, #tpu.memory_space<vmem>>, vector<1x8xf32>
    %7 = vector.broadcast %6 : vector<1x8xf32> to vector<128x8xf32>
    %8 = arith.addf %5, %7 : vector<128x8xf32>
    %cst_7 = arith.constant 0.000000e+00 : f32
    %9 = vector.broadcast %cst_7 : f32 to vector<128x8xf32>
    %10 = arith.maximumf %8, %9 : vector<128x8xf32>
    %11 = arith.truncf %10 : vector<128x8xf32> to vector<128x8xbf16>
    %c0_8 = arith.constant 0 : index
    %c0_9 = arith.constant 0 : index
    %12 = vector.load %arg5[%c0_8, %c0_9] : memref<128x8xbf16, #tpu.memory_space<vmem>>, vector<128x8xbf16>
    tpu.vector_store %arg5[%c0_8, %c0_9], %11 {strides = array<i32>} : memref<128x8xbf16, #tpu.memory_space<vmem>>, vector<128x8xbf16>,
    return
  }
  func.func @transform_0(%arg0: i32) -> (i32, i32) {
    %c0_i32 = arith.constant 0 : i32
    %c0_i32_0 = arith.constant 0 : i32
    return %arg0, %c0_i32 : i32, i32
  }
  func.func @transform_1(%arg0: i32) -> (i32, i32) {
    %c0_i32 = arith.constant 0 : i32
    %c0_i32_0 = arith.constant 0 : i32
    %c0_i32_1 = arith.constant 0 : i32
    return %c0_i32, %c0_i32_0 : i32, i32
  }
  func.func @transform_2(%arg0: i32) -> (i32, i32) {
    %c0_i32 = arith.constant 0 : i32
    %c0_i32_0 = arith.constant 0 : i32
    %c0_i32_1 = arith.constant 0 : i32
    return %c0_i32, %c0_i32_0 : i32, i32
  }
  func.func @transform_3(%arg0: i32) -> (i32, i32) {
    %c0_i32 = arith.constant 0 : i32
    %c0_i32_0 = arith.constant 0 : i32
    %c0_i32_1 = arith.constant 0 : i32
    return %c0_i32, %c0_i32_0 : i32, i32
  }
  func.func @transform_4(%arg0: i32) -> (i32, i32) {
    %c0_i32 = arith.constant 0 : i32
    %c0_i32_0 = arith.constant 0 : i32
    return %arg0, %c0_i32 : i32, i32
  }
}

module attributes {stable_mosaic.version = 11 : i64} {
  func.func @_mm_plain_kernel(%arg0: i32, %arg1: memref<128x4xbf16, #tpu.memory_space<vmem>>, %arg2: memref<4x8xbf16, #tpu.memory_space<vmem>>, %arg3: memref<128x8xf32, #tpu.memory_space<vmem>>) attributes {dimension_semantics = [#tpu.dimension_semantics<parallel>], iteration_bounds = array<i64: 1>, scalar_prefetch = 0 : i64, scratch_operands = 0 : i64, tpu.core_type = #tpu.core_type<tc>, window_params = [{transform_indices = @transform_0, window_bounds = array<i64: 128, 4>}, {pipeline_mode = #tpu.pipeline_mode<synchronous>, transform_indices = @transform_1, window_bounds = array<i64: 4, 8>}, {transform_indices = @transform_2, window_bounds = array<i64: 128, 8>}]} {
    %c0 = arith.constant 0 : index
    %c0_0 = arith.constant 0 : index
    %0 = vector.load %arg1[%c0, %c0_0] : memref<128x4xbf16, #tpu.memory_space<vmem>>, vector<128x4xbf16>
    %c0_1 = arith.constant 0 : index
    %c0_2 = arith.constant 0 : index
    %1 = vector.load %arg2[%c0_1, %c0_2] : memref<4x8xbf16, #tpu.memory_space<vmem>>, vector<4x8xbf16>
    %cst = arith.constant dense<0.000000e+00> : vector<128x8xf32>
    %2 = tpu.matmul %0, %1, %cst {dimension_numbers = #tpu.dot_dimension_numbers<[1], [0], [0], [1], [0, 0, 1, 1], [], []>} : vector<128x4xbf16>, vector<4x8xbf16>, vector<128x8xf32> -> vector<128x8xf32>
    %c0_3 = arith.constant 0 : index
    %c0_4 = arith.constant 0 : index
    %3 = vector.load %arg3[%c0_3, %c0_4] : memref<128x8xf32, #tpu.memory_space<vmem>>, vector<128x8xf32>
    tpu.vector_store %arg3[%c0_3, %c0_4], %2 {strides = array<i32>} : memref<128x8xf32, #tpu.memory_space<vmem>>, vector<128x8xf32>,
    return
  }
  func.func @transform_0(%arg0: i32) -> (i32, i32) {
    %c0_i32 = arith.constant 0 : i32
    %c0_i32_0 = arith.constant 0 : i32
    return %arg0, %c0_i32 : i32, i32
  }
  func.func @transform_1(%arg0: i32) -> (i32, i32) {
    %c0_i32 = arith.constant 0 : i32
    %c0_i32_0 = arith.constant 0 : i32
    %c0_i32_1 = arith.constant 0 : i32
    return %c0_i32, %c0_i32_0 : i32, i32
  }
  func.func @transform_2(%arg0: i32) -> (i32, i32) {
    %c0_i32 = arith.constant 0 : i32
    %c0_i32_0 = arith.constant 0 : i32
    return %arg0, %c0_i32 : i32, i32
  }
}

module attributes {stable_mosaic.version = 11 : i64} {
  func.func @_mm_residual_kernel(%arg0: i32, %arg1: memref<128x72xbf16, #tpu.memory_space<vmem>>, %arg2: memref<72x8xbf16, #tpu.memory_space<vmem>>, %arg3: memref<128x8xf32, #tpu.memory_space<vmem>>, %arg4: memref<128x8xf32, #tpu.memory_space<vmem>>) attributes {dimension_semantics = [#tpu.dimension_semantics<parallel>], iteration_bounds = array<i64: 1>, scalar_prefetch = 0 : i64, scratch_operands = 0 : i64, tpu.core_type = #tpu.core_type<tc>, window_params = [{transform_indices = @transform_0, window_bounds = array<i64: 128, 72>}, {pipeline_mode = #tpu.pipeline_mode<synchronous>, transform_indices = @transform_1, window_bounds = array<i64: 72, 8>}, {transform_indices = @transform_2, window_bounds = array<i64: 128, 8>}, {transform_indices = @transform_3, window_bounds = array<i64: 128, 8>}]} {
    %c0 = arith.constant 0 : index
    %c0_0 = arith.constant 0 : index
    %0 = vector.load %arg1[%c0, %c0_0] : memref<128x72xbf16, #tpu.memory_space<vmem>>, vector<128x72xbf16>
    %c0_1 = arith.constant 0 : index
    %c0_2 = arith.constant 0 : index
    %1 = vector.load %arg2[%c0_1, %c0_2] : memref<72x8xbf16, #tpu.memory_space<vmem>>, vector<72x8xbf16>
    %cst = arith.constant dense<0.000000e+00> : vector<128x8xf32>
    %2 = tpu.matmul %0, %1, %cst {dimension_numbers = #tpu.dot_dimension_numbers<[1], [0], [0], [1], [0, 0, 1, 1], [], []>} : vector<128x72xbf16>, vector<72x8xbf16>, vector<128x8xf32> -> vector<128x8xf32>
    %c0_3 = arith.constant 0 : index
    %c0_4 = arith.constant 0 : index
    %3 = vector.load %arg3[%c0_3, %c0_4] : memref<128x8xf32, #tpu.memory_space<vmem>>, vector<128x8xf32>
    %4 = arith.addf %2, %3 : vector<128x8xf32>
    %c0_5 = arith.constant 0 : index
    %c0_6 = arith.constant 0 : index
    %5 = vector.load %arg4[%c0_5, %c0_6] : memref<128x8xf32, #tpu.memory_space<vmem>>, vector<128x8xf32>
    tpu.vector_store %arg4[%c0_5, %c0_6], %4 {strides = array<i32>} : memref<128x8xf32, #tpu.memory_space<vmem>>, vector<128x8xf32>,
    return
  }
  func.func @transform_0(%arg0: i32) -> (i32, i32) {
    %c0_i32 = arith.constant 0 : i32
    %c0_i32_0 = arith.constant 0 : i32
    return %arg0, %c0_i32 : i32, i32
  }
  func.func @transform_1(%arg0: i32) -> (i32, i32) {
    %c0_i32 = arith.constant 0 : i32
    %c0_i32_0 = arith.constant 0 : i32
    %c0_i32_1 = arith.constant 0 : i32
    return %c0_i32, %c0_i32_0 : i32, i32
  }
  func.func @transform_2(%arg0: i32) -> (i32, i32) {
    %c0_i32 = arith.constant 0 : i32
    %c0_i32_0 = arith.constant 0 : i32
    return %arg0, %c0_i32 : i32, i32
  }
  func.func @transform_3(%arg0: i32) -> (i32, i32) {
    %c0_i32 = arith.constant 0 : i32
    %c0_i32_0 = arith.constant 0 : i32
    return %arg0, %c0_i32 : i32, i32
  }
}

module attributes {stable_mosaic.version = 11 : i64} {
  func.func @_mm_affine_relu_kernel(%arg0: i32, %arg1: memref<128x72xbf16, #tpu.memory_space<vmem>>, %arg2: memref<72x8xbf16, #tpu.memory_space<vmem>>, %arg3: memref<1x8xf32, #tpu.memory_space<vmem>>, %arg4: memref<1x8xf32, #tpu.memory_space<vmem>>, %arg5: memref<128x8xbf16, #tpu.memory_space<vmem>>) attributes {dimension_semantics = [#tpu.dimension_semantics<parallel>], iteration_bounds = array<i64: 1>, scalar_prefetch = 0 : i64, scratch_operands = 0 : i64, tpu.core_type = #tpu.core_type<tc>, window_params = [{transform_indices = @transform_0, window_bounds = array<i64: 128, 72>}, {pipeline_mode = #tpu.pipeline_mode<synchronous>, transform_indices = @transform_1, window_bounds = array<i64: 72, 8>}, {pipeline_mode = #tpu.pipeline_mode<synchronous>, transform_indices = @transform_2, window_bounds = array<i64: 1, 8>}, {pipeline_mode = #tpu.pipeline_mode<synchronous>, transform_indices = @transform_3, window_bounds = array<i64: 1, 8>}, {transform_indices = @transform_4, window_bounds = array<i64: 128, 8>}]} {
    %c0 = arith.constant 0 : index
    %c0_0 = arith.constant 0 : index
    %0 = vector.load %arg1[%c0, %c0_0] : memref<128x72xbf16, #tpu.memory_space<vmem>>, vector<128x72xbf16>
    %c0_1 = arith.constant 0 : index
    %c0_2 = arith.constant 0 : index
    %1 = vector.load %arg2[%c0_1, %c0_2] : memref<72x8xbf16, #tpu.memory_space<vmem>>, vector<72x8xbf16>
    %cst = arith.constant dense<0.000000e+00> : vector<128x8xf32>
    %2 = tpu.matmul %0, %1, %cst {dimension_numbers = #tpu.dot_dimension_numbers<[1], [0], [0], [1], [0, 0, 1, 1], [], []>} : vector<128x72xbf16>, vector<72x8xbf16>, vector<128x8xf32> -> vector<128x8xf32>
    %c0_3 = arith.constant 0 : index
    %c0_4 = arith.constant 0 : index
    %3 = vector.load %arg3[%c0_3, %c0_4] : memref<1x8xf32, #tpu.memory_space<vmem>>, vector<1x8xf32>
    %4 = vector.broadcast %3 : vector<1x8xf32> to vector<128x8xf32>
    %5 = arith.mulf %2, %4 : vector<128x8xf32>
    %c0_5 = arith.constant 0 : index
    %c0_6 = arith.constant 0 : index
    %6 = vector.load %arg4[%c0_5, %c0_6] : memref<1x8xf32, #tpu.memory_space<vmem>>, vector<1x8xf32>
    %7 = vector.broadcast %6 : vector<1x8xf32> to vector<128x8xf32>
    %8 = arith.addf %5, %7 : vector<128x8xf32>
    %cst_7 = arith.constant 0.000000e+00 : f32
    %9 = vector.broadcast %cst_7 : f32 to vector<128x8xf32>
    %10 = arith.maximumf %8, %9 : vector<128x8xf32>
    %11 = arith.truncf %10 : vector<128x8xf32> to vector<128x8xbf16>
    %c0_8 = arith.constant 0 : index
    %c0_9 = arith.constant 0 : index
    %12 = vector.load %arg5[%c0_8, %c0_9] : memref<128x8xbf16, #tpu.memory_space<vmem>>, vector<128x8xbf16>
    tpu.vector_store %arg5[%c0_8, %c0_9], %11 {strides = array<i32>} : memref<128x8xbf16, #tpu.memory_space<vmem>>, vector<128x8xbf16>,
    return
  }
  func.func @transform_0(%arg0: i32) -> (i32, i32) {
    %c0_i32 = arith.constant 0 : i32
    %c0_i32_0 = arith.constant 0 : i32
    return %arg0, %c0_i32 : i32, i32
  }
  func.func @transform_1(%arg0: i32) -> (i32, i32) {
    %c0_i32 = arith.constant 0 : i32
    %c0_i32_0 = arith.constant 0 : i32
    %c0_i32_1 = arith.constant 0 : i32
    return %c0_i32, %c0_i32_0 : i32, i32
  }
  func.func @transform_2(%arg0: i32) -> (i32, i32) {
    %c0_i32 = arith.constant 0 : i32
    %c0_i32_0 = arith.constant 0 : i32
    %c0_i32_1 = arith.constant 0 : i32
    return %c0_i32, %c0_i32_0 : i32, i32
  }
  func.func @transform_3(%arg0: i32) -> (i32, i32) {
    %c0_i32 = arith.constant 0 : i32
    %c0_i32_0 = arith.constant 0 : i32
    %c0_i32_1 = arith.constant 0 : i32
    return %c0_i32, %c0_i32_0 : i32, i32
  }
  func.func @transform_4(%arg0: i32) -> (i32, i32) {
    %c0_i32 = arith.constant 0 : i32
    %c0_i32_0 = arith.constant 0 : i32
    return %arg0, %c0_i32 : i32, i32
  }
}

</mosaic_0001>

<bundles_post_ra>
// kernel: network_block_forward.6
= control target key start
LH: loop header
LB: loop body
LE: loop exit
PB: predicated region body
PF: predicated region fallthrough
CT: control target
= control target key end

     0   :  { %vm94_vm0 = vcmask 1041408   ;;  %vm69_vm1 = vcmask 31744   ;;  %vm195_vm2 = vcmask 64512   ;;  %s385_s1 = inlined_call_operand.vmem [shape: bf16[4,8], index: 1, kind: input, shape index: {}]   ;;  %s386_s0 = inlined_call_operand.vmem [shape: bf16[128,4], index: 0, kind: input, shape index: {}]   ;;  %s387_s2 = inlined_call_operand.vmem [shape: f32[128,8], index: 2, kind: output, shape index: {}]  }
   0x1   :  { %v28_v0 = vld [vmem:[%s385_s1] sm:$0x3]  ;;  %v265_v4 = vld [vmem:[%s386_s0 + $0x8] sm:$0xff]   ;;  %v267_v6 = vld [vmem:[%s386_s0 + $0x10] sm:$0xff]  }
   0x2   :  { %261 = vmatprep.subr.msk.bf16.mxu0 %vm94_vm0, %v28_v0  ;;  %262 = vmatprep.subr.msk.bf16.mxu1 %vm94_vm0, %v28_v0  ;;  %v96_v1 = vsel %vm94_vm0, %v28_v0, 0  ;;  %v263_v2 = vld [vmem:[%s386_s0] sm:$0xff]   ;;  %v266_v5 = vld [vmem:[%s386_s0 + $0x28] sm:$0xff]   ;;  %v268_v7 = vld [vmem:[%s386_s0 + $0x30] sm:$0xff]  }
   0x3   :  { %242 = vmatpush3.bf16.msra.mxu0 %v96_v1  ;;  %260 = vmatpush3.bf16.msra.mxu1 %v96_v1  ;;  %v264_v3 = vld [vmem:[%s386_s0 + $0x20] sm:$0xff]   ;;  %v269_v8 = vld [vmem:[%s386_s0 + $0x18] sm:$0xff]  }
   0x4   :  { %243 = vmatprep.mubr.msk.bf16.mxu0 %vm69_vm1, %v263_v2  ;;  %251 = vmatprep.mubr.msk.bf16.mxu1 %vm69_vm1, %v264_v3  ;;  %v270_v9 = vld [vmem:[%s386_s0 + $0x38] sm:$0xff]  }
   0x6   :  { %244 = vmatmul.mubr.msk.bf16.vlgmr.msra.gmra.mrb[0].mxu0 %vm69_vm1, %v265_v4  ;;  %252 = vmatmul.mubr.msk.bf16.vlgmr.msra.gmra.mrb[0].mxu1 %vm69_vm1, %v266_v5 }
   0x7   :  { %247 = vmatprep.mubr.msk.bf16.mxu0 %vm69_vm1, %v267_v6  ;;  %255 = vmatprep.mubr.msk.bf16.mxu1 %vm69_vm1, %v268_v7 }
   0xe   :  { %248 = vmatmul.mubr.msk.bf16.gmra.mrb[4].mxu0 %vm69_vm1, %v269_v8  ;;  %256 = vmatmul.mubr.msk.bf16.gmra.mrb[4].mxu1 %vm69_vm1, %v270_v9 }
  0xd9   :  { %v245_v10 = vpop.f32.mrb[0].mxu0  ;;  %v253_v11 = vpop.f32.mrb[0].mxu1 }
  0xda   :  { %198 = vst.msk [vmem:[%s387_s2 + $0x10] sm:$0xff] %vm195_vm2, %v245_v10  ;;  %v132_v12 = vpop.f32.mrb[1].mxu0  ;;  %206 = vst.msk [vmem:[%s387_s2 + $0x50] sm:$0xff] %vm195_vm2, %v253_v11  ;;  %v164_v13 = vpop.f32.mrb[1].mxu1 }
  0xdb   :  { %196 = vst.msk [vmem:[%s387_s2] sm:$0xff] %vm195_vm2, %v132_v12  ;;  %v246_v14 = vpop.f32.mrb[2].mxu0  ;;  %204 = vst.msk [vmem:[%s387_s2 + $0x40] sm:$0xff] %vm195_vm2, %v164_v13  ;;  %v254_v15 = vpop.f32.mrb[2].mxu1 }
  0xdc   :  { %199 = vst.msk [vmem:[%s387_s2 + $0x18] sm:$0xff] %vm195_vm2, %v246_v14  ;;  %v135_v16 = vpop.f32.mrb[3].mxu0  ;;  %207 = vst.msk [vmem:[%s387_s2 + $0x58] sm:$0xff] %vm195_vm2, %v254_v15  ;;  %v167_v17 = vpop.f32.mrb[3].mxu1 }
  0xdd   :  { %197 = vst.msk [vmem:[%s387_s2 + $0x8] sm:$0xff] %vm195_vm2, %v135_v16  ;;  %205 = vst.msk [vmem:[%s387_s2 + $0x48] sm:$0xff] %vm195_vm2, %v167_v17 }
  0xe1   :  { %v249_v18 = vpop.f32.mrb[4].mxu0  ;;  %v257_v19 = vpop.f32.mrb[4].mxu1 }
  0xe2   :  { %202 = vst.msk [vmem:[%s387_s2 + $0x30] sm:$0xff] %vm195_vm2, %v249_v18  ;;  %v148_v20 = vpop.f32.mrb[5].mxu0  ;;  %210 = vst.msk [vmem:[%s387_s2 + $0x70] sm:$0xff] %vm195_vm2, %v257_v19  ;;  %v180_v21 = vpop.f32.mrb[5].mxu1 }
  0xe3   :  { %200 = vst.msk [vmem:[%s387_s2 + $0x20] sm:$0xff] %vm195_vm2, %v148_v20  ;;  %v250_v22 = vpop.f32.mrb[6].mxu0  ;;  %208 = vst.msk [vmem:[%s387_s2 + $0x60] sm:$0xff] %vm195_vm2, %v180_v21  ;;  %v258_v23 = vpop.f32.mrb[6].mxu1 }
  0xe4   :  { %203 = vst.msk [vmem:[%s387_s2 + $0x38] sm:$0xff] %vm195_vm2, %v250_v22  ;;  %v151_v24 = vpop.f32.mrb[7].mxu0  ;;  %211 = vst.msk [vmem:[%s387_s2 + $0x78] sm:$0xff] %vm195_vm2, %v258_v23  ;;  %v183_v25 = vpop.f32.mrb[7].mxu1 }
  0xe5   :  { %201 = vst.msk [vmem:[%s387_s2 + $0x28] sm:$0xff] %vm195_vm2, %v151_v24  ;;  %209 = vst.msk [vmem:[%s387_s2 + $0x68] sm:$0xff] %vm195_vm2, %v183_v25 }

// kernel: network_block_forward.5
= control target key start
LH: loop header
LB: loop body
LE: loop exit
PB: predicated region body
PF: predicated region fallthrough
CT: control target
= control target key end

     0   :  { %vm94_vm0 = vcmask 293888   ;;  %vm119_vm1 = vcmask 1041408   ;;  %vm346_vm2 = vcmask 60416   ;;  %s644_s1 = inlined_call_operand.vmem [shape: bf16[36,8], index: 1, kind: input, shape index: {}]   ;;  %s645_s0 = inlined_call_operand.vmem [shape: bf16[128,36], index: 0, kind: input, shape index: {}]   ;;  %s646_s2 = inlined_call_operand.vmem [shape: f32[1,8], index: 2, kind: input, shape index: {}]   ;;  %s647_s3 = inlined_call_operand.vmem [shape: f32[1,8], index: 3, kind: input, shape index: {}]   ;;  %s648_s4 = inlined_call_operand.vmem [shape: bf16[128,8], index: 4, kind: output, shape index: {}]  }
   0x1   :  { %v461_v0 = vld [vmem:[%s644_s1] sm:$0xff]   ;;  %v462_v1 = vld [vmem:[%s644_s1 + $0x8] sm:$0xff]   ;;  %v463_v2 = vld [vmem:[%s644_s1 + $0x10] ss:$0 sps:$4 sm:$0x33]  }
   0x2   :  { %431 = vmatprep.subr.bf16.mxu0 %v461_v0  ;;  %453 = vmatprep.subr.bf16.mxu1 %v461_v0  ;;  %v464_v3 = vld [vmem:[%s645_s0] sm:$0xff]   ;;  %v121_v5 = vsel %vm119_vm1, %v463_v2, 0  ;;  %v466_v6 = vld [vmem:[%s645_s0 + $0x8] sm:$0xff]   ;;  %v468_v8 = vld [vmem:[%s645_s0 + $0x10] sm:$0xff]  }
   0x3   :  { %432 = vmatpush3.bf16.msra.mxu0 %v461_v0  ;;  %456 = vmatpush3.bf16.msra.mxu1 %v461_v0  ;;  %v465_v4 = vld [vmem:[%s645_s0 + $0x20] sm:$0xff]   ;;  %v467_v7 = vld [vmem:[%s645_s0 + $0x28] sm:$0xff]   ;;  %v469_v9 = vld [vmem:[%s645_s0 + $0x30] sm:$0xff]  }
   0x4   :  { %433 = vmatprep.subr.bf16.mxu0 %v462_v1  ;;  %454 = vmatprep.subr.bf16.mxu1 %v462_v1  ;;  %v470_v10 = vld [vmem:[%s645_s0 + $0x18] sm:$0xff]   ;;  %v541_v12 = vld [vmem:[%s646_s2] ss:$0 sm:$0xff] }
   0x5   :  { %437 = vmatprep.mubr.msk.bf16.mxu0 %vm94_vm0, %v464_v3  ;;  %445 = vmatprep.mubr.msk.bf16.mxu1 %vm94_vm0, %v465_v4  ;;  %v471_v11 = vld [vmem:[%s645_s0 + $0x38] sm:$0xff]   ;;  %v546_v14 = vld [vmem:[%s647_s3] ss:$0 sm:$0xff] }
   0x7   :  { %434 = vmatpush3.bf16.msra.mxu0 %v462_v1  ;;  %457 = vmatpush3.bf16.msra.mxu1 %v462_v1 }
   0x8   :  { %459 = vmatprep.subr.msk.bf16.mxu0 %vm119_vm1, %v463_v2  ;;  %460 = vmatprep.subr.msk.bf16.mxu1 %vm119_vm1, %v463_v2 }
   0xb   :  { %436 = vmatpush3.bf16.msra.mxu0 %v121_v5  ;;  %458 = vmatpush3.bf16.msra.mxu1 %v121_v5 }
   0xe   :  { %438 = vmatmul.mubr.msk.bf16.vlgmr.msra.gmra.mrb[0].mxu0 %vm94_vm0, %v466_v6  ;;  %446 = vmatmul.mubr.msk.bf16.vlgmr.msra.gmra.mrb[0].mxu1 %vm94_vm0, %v467_v7 }
   0xf   :  { %441 = vmatprep.mubr.msk.bf16.mxu0 %vm94_vm0, %v468_v8  ;;  %449 = vmatprep.mubr.msk.bf16.mxu1 %vm94_vm0, %v469_v9 }
  0x16   :  { %442 = vmatmul.mubr.msk.bf16.gmra.mrb[4].mxu0 %vm94_vm0, %v470_v10  ;;  %450 = vmatmul.mubr.msk.bf16.gmra.mrb[4].mxu1 %vm94_vm0, %v471_v11 }
  0xe1   :  { %v439_v13 = vpop.f32.mrb[0].mxu0  ;;  %v447_v15 = vpop.f32.mrb[0].mxu1 }
  0xe2   :  { %v229_v16 = vmul.f32 %v439_v13, %v541_v12  ;;  %v237_v17 = vmul.f32 %v447_v15, %v541_v12  ;;  %v157_v18 = vpop.f32.mrb[1].mxu0  ;;  %v189_v19 = vpop.f32.mrb[1].mxu1 }
  0xe3   :  { %v227_v20 = vmul.f32 %v541_v12, %v157_v18  ;;  %v235_v21 = vmul.f32 %v541_v12, %v189_v19  ;;  %v440_v22 = vpop.f32.mrb[2].mxu0  ;;  %v448_v23 = vpop.f32.mrb[2].mxu1 }
  0xe4   :  { %v252_v24 = vadd.f32 %v546_v14, %v229_v16  ;;  %v260_v25 = vadd.f32 %v546_v14, %v237_v17  ;;  %v230_v26 = vmul.f32 %v440_v22, %v541_v12  ;;  %v238_v27 = vmul.f32 %v448_v23, %v541_v12  ;;  %v160_v28 = vpop.f32.mrb[3].mxu0  ;;  %v192_v29 = vpop.f32.mrb[3].mxu1 }
  0xe5   :  { %v250_v30 = vadd.f32 %v546_v14, %v227_v20  ;;  %v258_v31 = vadd.f32 %v546_v14, %v235_v21  ;;  %v228_v32 = vmul.f32 %v541_v12, %v160_v28  ;;  %v236_v33 = vmul.f32 %v541_v12, %v192_v29 }
  0xe6   :  { %v268_v34 = vmax.f32 %v252_v24, 0.0  ;;  %v276_v35 = vmax.f32 %v260_v25, 0.0  ;;  %v253_v36 = vadd.f32 %v546_v14, %v230_v26  ;;  %v261_v37 = vadd.f32 %v546_v14, %v238_v27 }
  0xe7   :  { %v266_v38 = vmax.f32 %v250_v30, 0.0  ;;  %v274_v39 = vmax.f32 %v258_v31, 0.0  ;;  %v251_v40 = vadd.f32 %v546_v14, %v228_v32  ;;  %v259_v41 = vadd.f32 %v546_v14, %v236_v33 }
  0xe8   :  { %v406_v42 = vpack.c.bf16 %v268_v34, %v268_v34  ;;  %v414_v43 = vpack.c.bf16 %v276_v35, %v276_v35  ;;  %v269_v44 = vmax.f32 %v253_v36, 0.0  ;;  %v277_v45 = vmax.f32 %v261_v37, 0.0 }
  0xe9   :  { %v404_v46 = vpack.c.bf16 %v266_v38, %v266_v38  ;;  %v412_v47 = vpack.c.bf16 %v274_v39, %v274_v39  ;;  %v267_v48 = vmax.f32 %v251_v40, 0.0  ;;  %v275_v49 = vmax.f32 %v259_v41, 0.0  ;;  %v443_v50 = vpop.f32.mrb[4].mxu0  ;;  %v451_v51 = vpop.f32.mrb[4].mxu1 }
  0xea   :  { %349 = vst.msk [vmem:[%s648_s4 + $0x8] sm:$0xf] %vm346_vm2, %v406_v42  ;;  %357 = vst.msk [vmem:[%s648_s4 + $0x28] sm:$0xf] %vm346_vm2, %v414_v43  ;;  %v407_v52 = vpack.c.bf16 %v269_v44, %v269_v44  ;;  %v415_v53 = vpack.c.bf16 %v277_v45, %v277_v45  ;;  %v233_v54 = vmul.f32 %v443_v50, %v541_v12  ;;  %v173_v56 = vpop.f32.mrb[5].mxu0  ;;  %v205_v57 = vpop.f32.mrb[5].mxu1 }
  0xeb   :  { %v241_v55 = vmul.f32 %v451_v51, %v541_v12  ;;  %347 = vst.msk [vmem:[%s648_s4] sm:$0xf] %vm346_vm2, %v404_v46  ;;  %355 = vst.msk [vmem:[%s648_s4 + $0x20] sm:$0xf] %vm346_vm2, %v412_v47  ;;  %v405_v58 = vpack.c.bf16 %v267_v48, %v267_v48  ;;  %v413_v59 = vpack.c.bf16 %v275_v49, %v275_v49  ;;  %v444_v62 = vpop.f32.mrb[6].mxu0  ;;  %v452_v63 = vpop.f32.mrb[6].mxu1 }
  0xec   :  { %v231_v60 = vmul.f32 %v541_v12, %v173_v56  ;;  %v239_v61 = vmul.f32 %v541_v12, %v205_v57  ;;  %350 = vst.msk [vmem:[%s648_s4 + $0xc] sm:$0xf] %vm346_vm2, %v407_v52  ;;  %358 = vst.msk [vmem:[%s648_s4 + $0x2c] sm:$0xf] %vm346_vm2, %v415_v53  ;;  %v256_v0 = vadd.f32 %v546_v14, %v233_v54  ;;  %v176_v4 = vpop.f32.mrb[7].mxu0  ;;  %v208_v5 = vpop.f32.mrb[7].mxu1 }
  0xed   :  { %v264_v1 = vadd.f32 %v546_v14, %v241_v55  ;;  %v234_v2 = vmul.f32 %v444_v62, %v541_v12  ;;  %v242_v3 = vmul.f32 %v452_v63, %v541_v12  ;;  %348 = vst.msk [vmem:[%s648_s4 + $0x4] sm:$0xf] %vm346_vm2, %v405_v58  ;;  %356 = vst.msk [vmem:[%s648_s4 + $0x24] sm:$0xf] %vm346_vm2, %v413_v59 }
  0xee   :  { %v254_v6 = vadd.f32 %v546_v14, %v231_v60  ;;  %v262_v7 = vadd.f32 %v546_v14, %v239_v61  ;;  %v232_v8 = vmul.f32 %v541_v12, %v176_v4  ;;  %v240_v9 = vmul.f32 %v541_v12, %v208_v5 }
  0xef   :  { %v272_v10 = vmax.f32 %v256_v0, 0.0  ;;  %v280_v11 = vmax.f32 %v264_v1, 0.0  ;;  %v257_v13 = vadd.f32 %v546_v14, %v234_v2  ;;  %v265_v15 = vadd.f32 %v546_v14, %v242_v3 }
  0xf0   :  { %v270_v16 = vmax.f32 %v254_v6, 0.0  ;;  %v278_v17 = vmax.f32 %v262_v7, 0.0  ;;  %v255_v18 = vadd.f32 %v546_v14, %v232_v8  ;;  %v263_v19 = vadd.f32 %v546_v14, %v240_v9 }
  0xf1   :  { %v410_v20 = vpack.c.bf16 %v272_v10, %v272_v10  ;;  %v418_v21 = vpack.c.bf16 %v280_v11, %v280_v11  ;;  %v273_v22 = vmax.f32 %v257_v13, 0.0  ;;  %v281_v23 = vmax.f32 %v265_v15, 0.0 }
  0xf2   :  { %v408_v24 = vpack.c.bf16 %v270_v16, %v270_v16  ;;  %v416_v25 = vpack.c.bf16 %v278_v17, %v278_v17  ;;  %v271_v26 = vmax.f32 %v255_v18, 0.0  ;;  %v279_v12 = vmax.f32 %v263_v19, 0.0 }
  0xf3   :  { %353 = vst.msk [vmem:[%s648_s4 + $0x18] sm:$0xf] %vm346_vm2, %v410_v20  ;;  %361 = vst.msk [vmem:[%s648_s4 + $0x38] sm:$0xf] %vm346_vm2, %v418_v21  ;;  %v411_v27 = vpack.c.bf16 %v273_v22, %v273_v22  ;;  %v419_v14 = vpack.c.bf16 %v281_v23, %v281_v23 }
  0xf4   :  { %351 = vst.msk [vmem:[%s648_s4 + $0x10] sm:$0xf] %vm346_vm2, %v408_v24  ;;  %359 = vst.msk [vmem:[%s648_s4 + $0x30] sm:$0xf] %vm346_vm2, %v416_v25  ;;  %v409_v28 = vpack.c.bf16 %v271_v26, %v271_v26  ;;  %v417_v29 = vpack.c.bf16 %v279_v12, %v279_v12 }
  0xf5   :  { %354 = vst.msk [vmem:[%s648_s4 + $0x1c] sm:$0xf] %vm346_vm2, %v411_v27  ;;  %362 = vst.msk [vmem:[%s648_s4 + $0x3c] sm:$0xf] %vm346_vm2, %v419_v14 }
  0xf6   :  { %352 = vst.msk [vmem:[%s648_s4 + $0x14] sm:$0xf] %vm346_vm2, %v409_v28  ;;  %360 = vst.msk [vmem:[%s648_s4 + $0x34] sm:$0xf] %vm346_vm2, %v417_v29 }

// kernel: network_block_forward.7
= control target key start
LH: loop header
LB: loop body
LE: loop exit
PB: predicated region body
PF: predicated region fallthrough
CT: control target
= control target key end

     0   :  { %vm123_vm0 = vcmask 588800   ;;  %vm148_vm1 = vcmask 1043456   ;;  %vm249_vm2 = vcmask 64512   ;;  %s534_s1 = inlined_call_operand.vmem [shape: bf16[72,8], index: 1, kind: input, shape index: {}]   ;;  %s535_s0 = inlined_call_operand.vmem [shape: bf16[128,72], index: 0, kind: input, shape index: {}]   ;;  %s536_s2 = inlined_call_operand.vmem [shape: f32[128,8], index: 2, kind: input, shape index: {}]   ;;  %s537_s3 = inlined_call_operand.vmem [shape: f32[128,8], index: 3, kind: output, shape index: {}]  }
   0x1   :  { %v342_v0 = vld [vmem:[%s534_s1] sm:$0xff]   ;;  %v343_v1 = vld [vmem:[%s534_s1 + $0x8] sm:$0xff]   ;;  %v344_v2 = vld [vmem:[%s534_s1 + $0x10] sm:$0xff]  }
   0x2   :  { %304 = vmatprep.subr.bf16.mxu0 %v342_v0  ;;  %330 = vmatprep.subr.bf16.mxu1 %v342_v0  ;;  %v347_v3 = vld [vmem:[%s535_s0] sm:$0xff]   ;;  %v345_v5 = vld [vmem:[%s534_s1 + $0x18] sm:$0xff]   ;;  %v349_v8 = vld [vmem:[%s535_s0 + $0x8] sm:$0xff]  }
   0x3   :  { %305 = vmatpush3.bf16.msra.mxu0 %v342_v0  ;;  %335 = vmatpush3.bf16.msra.mxu1 %v342_v0  ;;  %v348_v4 = vld [vmem:[%s535_s0 + $0x20] sm:$0xff]   ;;  %v350_v9 = vld [vmem:[%s535_s0 + $0x28] sm:$0xff]   ;;  %v351_v10 = vld [vmem:[%s535_s0 + $0x10] sm:$0xff]  }
   0x4   :  { %306 = vmatprep.subr.bf16.mxu0 %v343_v1  ;;  %331 = vmatprep.subr.bf16.mxu1 %v343_v1  ;;  %v346_v6 = vld [vmem:[%s534_s1 + $0x20] ss:$0 sps:$4 sm:$0xff]   ;;  %v352_v11 = vld [vmem:[%s535_s0 + $0x30] sm:$0xff]   ;;  %v353_v12 = vld [vmem:[%s535_s0 + $0x18] sm:$0xff]  }
   0x5   :  { %314 = vmatprep.mubr.msk.bf16.mxu0 %vm123_vm0, %v347_v3  ;;  %322 = vmatprep.mubr.msk.bf16.mxu1 %vm123_vm0, %v348_v4  ;;  %v150_v7 = vsel %vm148_vm1, %v346_v6, 0  ;;  %v354_v13 = vld [vmem:[%s535_s0 + $0x38] sm:$0xff]   ;;  %v42_v14 = vld [vmem:[%s536_s2 + $0x10] sm:$0xff]  ;;  %v40_v16 = vld [vmem:[%s536_s2] sm:$0xff] }
   0x6   :  { %v50_v15 = vld [vmem:[%s536_s2 + $0x50] sm:$0xff]  ;;  %v48_v17 = vld [vmem:[%s536_s2 + $0x40] sm:$0xff]  ;;  %v43_v20 = vld [vmem:[%s536_s2 + $0x18] sm:$0xff] }
   0x7   :  { %307 = vmatpush3.bf16.msra.mxu0 %v343_v1  ;;  %336 = vmatpush3.bf16.msra.mxu1 %v343_v1  ;;  %v51_v21 = vld [vmem:[%s536_s2 + $0x58] sm:$0xff]  ;;  %v41_v26 = vld [vmem:[%s536_s2 + $0x8] sm:$0xff]  ;;  %v46_v38 = vld [vmem:[%s536_s2 + $0x30] sm:$0xff] }
   0x8   :  { %308 = vmatprep.subr.bf16.mxu0 %v344_v2  ;;  %332 = vmatprep.subr.bf16.mxu1 %v344_v2  ;;  %v49_v27 = vld [vmem:[%s536_s2 + $0x48] sm:$0xff]  ;;  %v54_v39 = vld [vmem:[%s536_s2 + $0x70] sm:$0xff]  ;;  %v44_v40 = vld [vmem:[%s536_s2 + $0x20] sm:$0xff] }
   0x9   :  { %v52_v41 = vld [vmem:[%s536_s2 + $0x60] sm:$0xff]  ;;  %v47_v44 = vld [vmem:[%s536_s2 + $0x38] sm:$0xff]  ;;  %v45_v50 = vld [vmem:[%s536_s2 + $0x28] sm:$0xff] }
   0xa   :  { %v55_v45 = vld [vmem:[%s536_s2 + $0x78] sm:$0xff]  ;;  %v53_v51 = vld [vmem:[%s536_s2 + $0x68] sm:$0xff] }
   0xb   :  { %309 = vmatpush3.bf16.msra.mxu0 %v344_v2  ;;  %337 = vmatpush3.bf16.msra.mxu1 %v344_v2 }
   0xc   :  { %310 = vmatprep.subr.bf16.mxu0 %v345_v5  ;;  %333 = vmatprep.subr.bf16.mxu1 %v345_v5 }
   0xf   :  { %311 = vmatpush3.bf16.msra.mxu0 %v345_v5  ;;  %338 = vmatpush3.bf16.msra.mxu1 %v345_v5 }
  0x10   :  { %340 = vmatprep.subr.msk.bf16.mxu0 %vm148_vm1, %v346_v6  ;;  %341 = vmatprep.subr.msk.bf16.mxu1 %vm148_vm1, %v346_v6 }
  0x13   :  { %313 = vmatpush3.bf16.msra.mxu0 %v150_v7  ;;  %339 = vmatpush3.bf16.msra.mxu1 %v150_v7 }
  0x16   :  { %315 = vmatmul.mubr.msk.bf16.vlgmr.msra.gmra.mrb[0].mxu0 %vm123_vm0, %v349_v8  ;;  %323 = vmatmul.mubr.msk.bf16.vlgmr.msra.gmra.mrb[0].mxu1 %vm123_vm0, %v350_v9 }
  0x17   :  { %318 = vmatprep.mubr.msk.bf16.mxu0 %vm123_vm0, %v351_v10  ;;  %326 = vmatprep.mubr.msk.bf16.mxu1 %vm123_vm0, %v352_v11 }
  0x1e   :  { %319 = vmatmul.mubr.msk.bf16.gmra.mrb[4].mxu0 %vm123_vm0, %v353_v12  ;;  %327 = vmatmul.mubr.msk.bf16.gmra.mrb[4].mxu1 %vm123_vm0, %v354_v13 }
  0xe9   :  { %v316_v18 = vpop.f32.mrb[0].mxu0  ;;  %v324_v19 = vpop.f32.mrb[0].mxu1 }
  0xea   :  { %v195_v22 = vadd.f32 %v316_v18, %v42_v14  ;;  %v227_v23 = vadd.f32 %v324_v19, %v50_v15  ;;  %v186_v24 = vpop.f32.mrb[1].mxu0  ;;  %v218_v25 = vpop.f32.mrb[1].mxu1 }
  0xeb   :  { %v187_v28 = vadd.f32 %v186_v24, %v40_v16  ;;  %v219_v29 = vadd.f32 %v218_v25, %v48_v17  ;;  %v317_v30 = vpop.f32.mrb[2].mxu0  ;;  %v325_v31 = vpop.f32.mrb[2].mxu1 }
  0xec   :  { %252 = vst.msk [vmem:[%s537_s3 + $0x10] sm:$0xff] %vm249_vm2, %v195_v22  ;;  %260 = vst.msk [vmem:[%s537_s3 + $0x50] sm:$0xff] %vm249_vm2, %v227_v23  ;;  %v198_v32 = vadd.f32 %v317_v30, %v43_v20  ;;  %v230_v33 = vadd.f32 %v325_v31, %v51_v21  ;;  %v189_v34 = vpop.f32.mrb[3].mxu0  ;;  %v221_v35 = vpop.f32.mrb[3].mxu1 }
  0xed   :  { %250 = vst.msk [vmem:[%s537_s3] sm:$0xff] %vm249_vm2, %v187_v28  ;;  %258 = vst.msk [vmem:[%s537_s3 + $0x40] sm:$0xff] %vm249_vm2, %v219_v29  ;;  %v190_v36 = vadd.f32 %v189_v34, %v41_v26  ;;  %v222_v37 = vadd.f32 %v221_v35, %v49_v27 }
  0xee   :  { %253 = vst.msk [vmem:[%s537_s3 + $0x18] sm:$0xff] %vm249_vm2, %v198_v32  ;;  %261 = vst.msk [vmem:[%s537_s3 + $0x58] sm:$0xff] %vm249_vm2, %v230_v33 }
  0xef   :  { %251 = vst.msk [vmem:[%s537_s3 + $0x8] sm:$0xff] %vm249_vm2, %v190_v36  ;;  %259 = vst.msk [vmem:[%s537_s3 + $0x48] sm:$0xff] %vm249_vm2, %v222_v37 }
  0xf1   :  { %v320_v42 = vpop.f32.mrb[4].mxu0  ;;  %v328_v43 = vpop.f32.mrb[4].mxu1 }
  0xf2   :  { %v211_v46 = vadd.f32 %v320_v42, %v46_v38  ;;  %v243_v47 = vadd.f32 %v328_v43, %v54_v39  ;;  %v202_v48 = vpop.f32.mrb[5].mxu0  ;;  %v234_v49 = vpop.f32.mrb[5].mxu1 }
  0xf3   :  { %v203_v52 = vadd.f32 %v202_v48, %v44_v40  ;;  %v235_v53 = vadd.f32 %v234_v49, %v52_v41  ;;  %v321_v54 = vpop.f32.mrb[6].mxu0  ;;  %v329_v55 = vpop.f32.mrb[6].mxu1 }
  0xf4   :  { %256 = vst.msk [vmem:[%s537_s3 + $0x30] sm:$0xff] %vm249_vm2, %v211_v46  ;;  %264 = vst.msk [vmem:[%s537_s3 + $0x70] sm:$0xff] %vm249_vm2, %v243_v47  ;;  %v214_v56 = vadd.f32 %v321_v54, %v47_v44  ;;  %v246_v57 = vadd.f32 %v329_v55, %v55_v45  ;;  %v205_v58 = vpop.f32.mrb[7].mxu0  ;;  %v237_v59 = vpop.f32.mrb[7].mxu1 }
  0xf5   :  { %254 = vst.msk [vmem:[%s537_s3 + $0x20] sm:$0xff] %vm249_vm2, %v203_v52  ;;  %262 = vst.msk [vmem:[%s537_s3 + $0x60] sm:$0xff] %vm249_vm2, %v235_v53  ;;  %v206_v60 = vadd.f32 %v205_v58, %v45_v50  ;;  %v238_v61 = vadd.f32 %v237_v59, %v53_v51 }
  0xf6   :  { %257 = vst.msk [vmem:[%s537_s3 + $0x38] sm:$0xff] %vm249_vm2, %v214_v56  ;;  %265 = vst.msk [vmem:[%s537_s3 + $0x78] sm:$0xff] %vm249_vm2, %v246_v57 }
  0xf7   :  { %255 = vst.msk [vmem:[%s537_s3 + $0x28] sm:$0xff] %vm249_vm2, %v206_v60  ;;  %263 = vst.msk [vmem:[%s537_s3 + $0x68] sm:$0xff] %vm249_vm2, %v238_v61 }

// kernel: network_block_forward.8
= control target key start
LH: loop header
LB: loop body
LE: loop exit
PB: predicated region body
PF: predicated region fallthrough
CT: control target
= control target key end

     0   :  { %vm110_vm0 = vcmask 588800   ;;  %vm135_vm1 = vcmask 1043456   ;;  %vm362_vm2 = vcmask 60416   ;;  %s680_s1 = inlined_call_operand.vmem [shape: bf16[72,8], index: 1, kind: input, shape index: {}]   ;;  %s681_s0 = inlined_call_operand.vmem [shape: bf16[128,72], index: 0, kind: input, shape index: {}]   ;;  %s682_s2 = inlined_call_operand.vmem [shape: f32[1,8], index: 2, kind: input, shape index: {}]   ;;  %s683_s3 = inlined_call_operand.vmem [shape: f32[1,8], index: 3, kind: input, shape index: {}]   ;;  %s684_s4 = inlined_call_operand.vmem [shape: bf16[128,8], index: 4, kind: output, shape index: {}]  }
   0x1   :  { %v489_v0 = vld [vmem:[%s680_s1] sm:$0xff]   ;;  %v490_v1 = vld [vmem:[%s680_s1 + $0x8] sm:$0xff]   ;;  %v491_v2 = vld [vmem:[%s680_s1 + $0x10] sm:$0xff]  }
   0x2   :  { %451 = vmatprep.subr.bf16.mxu0 %v489_v0  ;;  %477 = vmatprep.subr.bf16.mxu1 %v489_v0  ;;  %v494_v3 = vld [vmem:[%s681_s0] sm:$0xff]   ;;  %v492_v5 = vld [vmem:[%s680_s1 + $0x18] sm:$0xff]   ;;  %v496_v8 = vld [vmem:[%s681_s0 + $0x8] sm:$0xff]  }
   0x3   :  { %452 = vmatpush3.bf16.msra.mxu0 %v489_v0  ;;  %482 = vmatpush3.bf16.msra.mxu1 %v489_v0  ;;  %v495_v4 = vld [vmem:[%s681_s0 + $0x20] sm:$0xff]   ;;  %v497_v9 = vld [vmem:[%s681_s0 + $0x28] sm:$0xff]   ;;  %v498_v10 = vld [vmem:[%s681_s0 + $0x10] sm:$0xff]  }
   0x4   :  { %453 = vmatprep.subr.bf16.mxu0 %v490_v1  ;;  %478 = vmatprep.subr.bf16.mxu1 %v490_v1  ;;  %v493_v6 = vld [vmem:[%s680_s1 + $0x20] ss:$0 sps:$4 sm:$0xff]   ;;  %v499_v11 = vld [vmem:[%s681_s0 + $0x30] sm:$0xff]   ;;  %v500_v12 = vld [vmem:[%s681_s0 + $0x18] sm:$0xff]  }
   0x5   :  { %461 = vmatprep.mubr.msk.bf16.mxu0 %vm110_vm0, %v494_v3  ;;  %469 = vmatprep.mubr.msk.bf16.mxu1 %vm110_vm0, %v495_v4  ;;  %v137_v7 = vsel %vm135_vm1, %v493_v6, 0  ;;  %v501_v13 = vld [vmem:[%s681_s0 + $0x38] sm:$0xff]   ;;  %v577_v14 = vld [vmem:[%s682_s2] ss:$0 sm:$0xff] }
   0x6   :  { %v582_v16 = vld [vmem:[%s683_s3] ss:$0 sm:$0xff] }
   0x7   :  { %454 = vmatpush3.bf16.msra.mxu0 %v490_v1  ;;  %483 = vmatpush3.bf16.msra.mxu1 %v490_v1 }
   0x8   :  { %455 = vmatprep.subr.bf16.mxu0 %v491_v2  ;;  %479 = vmatprep.subr.bf16.mxu1 %v491_v2 }
   0xb   :  { %456 = vmatpush3.bf16.msra.mxu0 %v491_v2  ;;  %484 = vmatpush3.bf16.msra.mxu1 %v491_v2 }
   0xc   :  { %457 = vmatprep.subr.bf16.mxu0 %v492_v5  ;;  %480 = vmatprep.subr.bf16.mxu1 %v492_v5 }
   0xf   :  { %458 = vmatpush3.bf16.msra.mxu0 %v492_v5  ;;  %485 = vmatpush3.bf16.msra.mxu1 %v492_v5 }
  0x10   :  { %487 = vmatprep.subr.msk.bf16.mxu0 %vm135_vm1, %v493_v6  ;;  %488 = vmatprep.subr.msk.bf16.mxu1 %vm135_vm1, %v493_v6 }
  0x13   :  { %460 = vmatpush3.bf16.msra.mxu0 %v137_v7  ;;  %486 = vmatpush3.bf16.msra.mxu1 %v137_v7 }
  0x16   :  { %462 = vmatmul.mubr.msk.bf16.vlgmr.msra.gmra.mrb[0].mxu0 %vm110_vm0, %v496_v8  ;;  %470 = vmatmul.mubr.msk.bf16.vlgmr.msra.gmra.mrb[0].mxu1 %vm110_vm0, %v497_v9 }
  0x17   :  { %465 = vmatprep.mubr.msk.bf16.mxu0 %vm110_vm0, %v498_v10  ;;  %473 = vmatprep.mubr.msk.bf16.mxu1 %vm110_vm0, %v499_v11 }
  0x1e   :  { %466 = vmatmul.mubr.msk.bf16.gmra.mrb[4].mxu0 %vm110_vm0, %v500_v12  ;;  %474 = vmatmul.mubr.msk.bf16.gmra.mrb[4].mxu1 %vm110_vm0, %v501_v13 }
  0xe9   :  { %v463_v15 = vpop.f32.mrb[0].mxu0  ;;  %v471_v17 = vpop.f32.mrb[0].mxu1 }
  0xea   :  { %v245_v18 = vmul.f32 %v463_v15, %v577_v14  ;;  %v253_v19 = vmul.f32 %v471_v17, %v577_v14  ;;  %v173_v20 = vpop.f32.mrb[1].mxu0  ;;  %v205_v21 = vpop.f32.mrb[1].mxu1 }
  0xeb   :  { %v243_v22 = vmul.f32 %v577_v14, %v173_v20  ;;  %v251_v23 = vmul.f32 %v577_v14, %v205_v21  ;;  %v464_v24 = vpop.f32.mrb[2].mxu0  ;;  %v472_v25 = vpop.f32.mrb[2].mxu1 }
  0xec   :  { %v268_v26 = vadd.f32 %v582_v16, %v245_v18  ;;  %v276_v27 = vadd.f32 %v582_v16, %v253_v19  ;;  %v246_v28 = vmul.f32 %v464_v24, %v577_v14  ;;  %v254_v29 = vmul.f32 %v472_v25, %v577_v14  ;;  %v176_v30 = vpop.f32.mrb[3].mxu0  ;;  %v208_v31 = vpop.f32.mrb[3].mxu1 }
  0xed   :  { %v266_v32 = vadd.f32 %v582_v16, %v243_v22  ;;  %v274_v33 = vadd.f32 %v582_v16, %v251_v23  ;;  %v244_v34 = vmul.f32 %v577_v14, %v176_v30  ;;  %v252_v35 = vmul.f32 %v577_v14, %v208_v31 }
  0xee   :  { %v284_v36 = vmax.f32 %v268_v26, 0.0  ;;  %v292_v37 = vmax.f32 %v276_v27, 0.0  ;;  %v269_v38 = vadd.f32 %v582_v16, %v246_v28  ;;  %v277_v39 = vadd.f32 %v582_v16, %v254_v29 }
  0xef   :  { %v282_v40 = vmax.f32 %v266_v32, 0.0  ;;  %v290_v41 = vmax.f32 %v274_v33, 0.0  ;;  %v267_v42 = vadd.f32 %v582_v16, %v244_v34  ;;  %v275_v43 = vadd.f32 %v582_v16, %v252_v35 }
  0xf0   :  { %v424_v44 = vpack.c.bf16 %v284_v36, %v284_v36  ;;  %v432_v45 = vpack.c.bf16 %v292_v37, %v292_v37  ;;  %v285_v46 = vmax.f32 %v269_v38, 0.0  ;;  %v293_v47 = vmax.f32 %v277_v39, 0.0 }
  0xf1   :  { %v422_v48 = vpack.c.bf16 %v282_v40, %v282_v40  ;;  %v430_v49 = vpack.c.bf16 %v290_v41, %v290_v41  ;;  %v283_v50 = vmax.f32 %v267_v42, 0.0  ;;  %v291_v51 = vmax.f32 %v275_v43, 0.0  ;;  %v467_v52 = vpop.f32.mrb[4].mxu0  ;;  %v475_v53 = vpop.f32.mrb[4].mxu1 }
  0xf2   :  { %365 = vst.msk [vmem:[%s684_s4 + $0x8] sm:$0xf] %vm362_vm2, %v424_v44  ;;  %373 = vst.msk [vmem:[%s684_s4 + $0x28] sm:$0xf] %vm362_vm2, %v432_v45  ;;  %v425_v54 = vpack.c.bf16 %v285_v46, %v285_v46  ;;  %v433_v55 = vpack.c.bf16 %v293_v47, %v293_v47  ;;  %v249_v56 = vmul.f32 %v467_v52, %v577_v14  ;;  %v189_v58 = vpop.f32.mrb[5].mxu0  ;;  %v221_v59 = vpop.f32.mrb[5].mxu1 }
  0xf3   :  { %v257_v57 = vmul.f32 %v475_v53, %v577_v14  ;;  %363 = vst.msk [vmem:[%s684_s4] sm:$0xf] %vm362_vm2, %v422_v48  ;;  %371 = vst.msk [vmem:[%s684_s4 + $0x20] sm:$0xf] %vm362_vm2, %v430_v49  ;;  %v423_v60 = vpack.c.bf16 %v283_v50, %v283_v50  ;;  %v431_v61 = vpack.c.bf16 %v291_v51, %v291_v51  ;;  %v468_v0 = vpop.f32.mrb[6].mxu0  ;;  %v476_v1 = vpop.f32.mrb[6].mxu1 }
  0xf4   :  { %v247_v62 = vmul.f32 %v577_v14, %v189_v58  ;;  %v255_v63 = vmul.f32 %v577_v14, %v221_v59  ;;  %366 = vst.msk [vmem:[%s684_s4 + $0xc] sm:$0xf] %vm362_vm2, %v425_v54  ;;  %374 = vst.msk [vmem:[%s684_s4 + $0x2c] sm:$0xf] %vm362_vm2, %v433_v55  ;;  %v272_v2 = vadd.f32 %v582_v16, %v249_v56  ;;  %v192_v6 = vpop.f32.mrb[7].mxu0  ;;  %v224_v7 = vpop.f32.mrb[7].mxu1 }
  0xf5   :  { %v280_v3 = vadd.f32 %v582_v16, %v257_v57  ;;  %v250_v4 = vmul.f32 %v468_v0, %v577_v14  ;;  %v258_v5 = vmul.f32 %v476_v1, %v577_v14  ;;  %364 = vst.msk [vmem:[%s684_s4 + $0x4] sm:$0xf] %vm362_vm2, %v423_v60  ;;  %372 = vst.msk [vmem:[%s684_s4 + $0x24] sm:$0xf] %vm362_vm2, %v431_v61 }
  0xf6   :  { %v270_v8 = vadd.f32 %v582_v16, %v247_v62  ;;  %v278_v9 = vadd.f32 %v582_v16, %v255_v63  ;;  %v248_v10 = vmul.f32 %v577_v14, %v192_v6  ;;  %v256_v11 = vmul.f32 %v577_v14, %v224_v7 }
  0xf7   :  { %v288_v12 = vmax.f32 %v272_v2, 0.0  ;;  %v296_v13 = vmax.f32 %v280_v3, 0.0  ;;  %v273_v15 = vadd.f32 %v582_v16, %v250_v4  ;;  %v281_v17 = vadd.f32 %v582_v16, %v258_v5 }
  0xf8   :  { %v286_v18 = vmax.f32 %v270_v8, 0.0  ;;  %v294_v19 = vmax.f32 %v278_v9, 0.0  ;;  %v271_v20 = vadd.f32 %v582_v16, %v248_v10  ;;  %v279_v21 = vadd.f32 %v582_v16, %v256_v11 }
  0xf9   :  { %v428_v22 = vpack.c.bf16 %v288_v12, %v288_v12  ;;  %v436_v23 = vpack.c.bf16 %v296_v13, %v296_v13  ;;  %v289_v24 = vmax.f32 %v273_v15, 0.0  ;;  %v297_v25 = vmax.f32 %v281_v17, 0.0 }
  0xfa   :  { %v426_v26 = vpack.c.bf16 %v286_v18, %v286_v18  ;;  %v434_v27 = vpack.c.bf16 %v294_v19, %v294_v19  ;;  %v287_v28 = vmax.f32 %v271_v20, 0.0  ;;  %v295_v14 = vmax.f32 %v279_v21, 0.0 }
  0xfb   :  { %369 = vst.msk [vmem:[%s684_s4 + $0x18] sm:$0xf] %vm362_vm2, %v428_v22  ;;  %377 = vst.msk [vmem:[%s684_s4 + $0x38] sm:$0xf] %vm362_vm2, %v436_v23  ;;  %v429_v29 = vpack.c.bf16 %v289_v24, %v289_v24  ;;  %v437_v16 = vpack.c.bf16 %v297_v25, %v297_v25 }
  0xfc   :  { %367 = vst.msk [vmem:[%s684_s4 + $0x10] sm:$0xf] %vm362_vm2, %v426_v26  ;;  %375 = vst.msk [vmem:[%s684_s4 + $0x30] sm:$0xf] %vm362_vm2, %v434_v27  ;;  %v427_v30 = vpack.c.bf16 %v287_v28, %v287_v28  ;;  %v435_v31 = vpack.c.bf16 %v295_v14, %v295_v14 }
  0xfd   :  { %370 = vst.msk [vmem:[%s684_s4 + $0x1c] sm:$0xf] %vm362_vm2, %v429_v29  ;;  %378 = vst.msk [vmem:[%s684_s4 + $0x3c] sm:$0xf] %vm362_vm2, %v437_v16 }
  0xfe   :  { %368 = vst.msk [vmem:[%s684_s4 + $0x14] sm:$0xf] %vm362_vm2, %v427_v30  ;;  %376 = vst.msk [vmem:[%s684_s4 + $0x34] sm:$0xf] %vm362_vm2, %v435_v31 }

</bundles_post_ra>
